<compile_context>
chip_gen: v6e
topology: v6e:2x2x1
jax: 0.10.0
libtpu: 0.0.40
codegen_flags: <defaults>
</compile_context>

<pallas_src>
import math

import jax
import jax.numpy as jnp
from jax.experimental import pallas as pl
from jax.experimental.pallas import tpu as pltpu


def _round_up(x: int, m: int) -> int:
    return ((x + m - 1) // m) * m


def _tile_candidates(padded: int, unit: int):
    """All multiples of `unit` that evenly divide `padded` (ascending)."""
    return [t for t in range(unit, padded + 1, unit) if padded % t == 0]


_VMEM_BUDGET_BYTES = 20 << 20   # working budget for tile selection
_VMEM_LIMIT_BYTES = 32 << 20    # explicit scoped-VMEM limit (safe on v5e/v6e/v7x)


def _select_tiles(batch: int, out_dim: int, in_dim: int):
    bp8 = _round_up(batch, 8)
    np_ = _round_up(out_dim, 128)   # layout minimum only — tn divides this
    kp = _round_up(in_dim, 128)     # layout minimum only — tk divides this

    n_cands = _tile_candidates(np_, 128)
    k_cands = _tile_candidates(kp, 128)

    # Batch: one tile when possible so weights are streamed from HBM exactly once.
    tm = bp8 if bp8 <= 1024 else 512

    # out_dim: prefer >=2 tiles (megacore splits the weight matrix), cap at 512.
    tn_opts = [t for t in n_cands if t <= 512 and np_ // t >= 2]
    tn = max(tn_opts) if tn_opts else np_

    # in_dim: as big as possible (prefer full K), cap at 2048.
    tk = max(t for t in k_cands if t <= 2048)

    def vmem_bytes(tm_, tn_, tk_):
        multi_k = (kp // tk_) > 1
        b = 2 * 4 * (tm_ * tk_ + 2 * tn_ * tk_ + tm_ * tn_)   # dbl-buffered x, wmu, wsig, out
        b += 4 * tm_ * tn_ if multi_k else 0                  # f32 accumulator scratch
        b += 2 * 4 * (tk_ + 4 * tn_)                           # eps / bias vectors (tiny)
        return b

    # Shrink tk, then tm, then tn until the footprint fits the budget.
    while vmem_bytes(tm, tn, tk) > _VMEM_BUDGET_BYTES:
        k_smaller = [t for t in k_cands if t < tk]
        n_smaller = [t for t in n_cands if t < tn]
        if k_smaller:
            tk = max(k_smaller)
        elif tm > 8:
            tm = max(8, ((tm // 2) + 7) // 8 * 8)
        elif n_smaller:
            tn = max(n_smaller)
        else:
            break

    bp = _round_up(batch, tm)
    return tm, tn, tk, bp, np_, kp


# --------------------------------------------------------------------------- #
# Kernels
# --------------------------------------------------------------------------- #
def _noisy_linear_kernel_acc(x_ref, wmu_ref, wsig_ref, ein_ref, eoutc_ref,
                             bmu_ref, bsig_ref, eoutr_ref, o_ref, acc_ref):
    """Multi K-step variant: f32 VMEM accumulator, init/finalize via pl.when."""
    k = pl.program_id(2)

    @pl.when(k == 0)
    def _init():
        acc_ref[...] = jnp.zeros_like(acc_ref)

    # Rank-1 noise on the (tn, tk) weight tile: W_mu + W_sigma * (eps_out ⊗ eps_in)
    w_eff = wmu_ref[...] + wsig_ref[...] * (eoutc_ref[...] * ein_ref[...])

    # x (tm, tk) contracted with w_eff (tn, tk) along in_dim -> (tm, tn). NT form,
    # no transpose; f32 MXU accumulation.
    acc_ref[...] += jax.lax.dot_general(
        x_ref[...], w_eff,
        dimension_numbers=(((1,), (1,)), ((), ())),
        preferred_element_type=jnp.float32)

    @pl.when(k == pl.num_programs(2) - 1)
    def _finalize():
        b_eff = bmu_ref[...] + bsig_ref[...] * eoutr_ref[...]        # (1, tn)
        o_ref[...] = (acc_ref[...] + b_eff).astype(o_ref.dtype)


def _noisy_linear_kernel_single(x_ref, wmu_ref, wsig_ref, ein_ref, eoutc_ref,
                                bmu_ref, bsig_ref, eoutr_ref, o_ref):
    """Single K-step fast path: no accumulator, no pl.when, direct store."""
    w_eff = wmu_ref[...] + wsig_ref[...] * (eoutc_ref[...] * ein_ref[...])
    b_eff = bmu_ref[...] + bsig_ref[...] * eoutr_ref[...]            # (1, tn)
    y = jax.lax.dot_general(
        x_ref[...], w_eff,
        dimension_numbers=(((1,), (1,)), ((), ())),
        preferred_element_type=jnp.float32)
    o_ref[...] = (y + b_eff).astype(o_ref.dtype)


# --------------------------------------------------------------------------- #
# Wrapper
# --------------------------------------------------------------------------- #
def noisy_linear(x, weight_mu, weight_sigma, eps_in, eps_out,
                 bias_mu, bias_sigma, *, tiles=None):
    """NoisyLinear forward.

    x            : (batch, in_dim) f32
    weight_mu    : (out_dim, in_dim)
    weight_sigma : (out_dim, in_dim)
    eps_in       : (in_dim,)   factored noise (weight_epsilon == outer(eps_out, eps_in))
    eps_out      : (out_dim,)  factored noise (bias_epsilon   == eps_out)
    bias_mu      : (out_dim,)
    bias_sigma   : (out_dim,)
    tiles        : optional (tm, tn, tk) override (mainly for tests)
    Returns (batch, out_dim) f32.
    """
    f32 = jnp.float32
    batch, in_dim = x.shape
    out_dim, _ = weight_mu.shape

    if tiles is None:
        tm, tn, tk, bp, np_, kp = _select_tiles(batch, out_dim, in_dim)
    else:
        tm, tn, tk = tiles
        bp = _round_up(batch, tm)
        np_ = _round_up(out_dim, tn)
        kp = _round_up(in_dim, tk)

    def pad2(a, rows, cols):
        a = a.astype(f32)
        pr, pc = rows - a.shape[0], cols - a.shape[1]
        if pr == 0 and pc == 0:
            return a                       # no-op when already aligned
        return jnp.pad(a, ((0, pr), (0, pc)))

    xp    = pad2(x, bp, kp)
    wmup  = pad2(weight_mu, np_, kp)
    wsigp = pad2(weight_sigma, np_, kp)
    einp  = pad2(eps_in.reshape(1, in_dim), 1, kp)          # (1, Kp)
    eoutc = pad2(eps_out.reshape(out_dim, 1), np_, 1)       # (Np, 1) — weight-tile noise
    eoutr = pad2(eps_out.reshape(1, out_dim), 1, np_)       # (1, Np) — bias noise
    bmup  = pad2(bias_mu.reshape(1, out_dim), 1, np_)
    bsigp = pad2(bias_sigma.reshape(1, out_dim), 1, np_)

    n_i, n_j, n_k = bp // tm, np_ // tn, kp // tk

    cost = pl.CostEstimate(
        flops=2 * bp * np_ * kp + 3 * np_ * kp * n_i,
        transcendentals=0,
        bytes_accessed=4 * (bp * kp + 2 * np_ * kp * n_i + bp * np_))

    if n_k == 1:
        grid_spec = pltpu.PrefetchScalarGridSpec(
            num_scalar_prefetch=0,
            grid=(n_i, n_j),
            in_specs=[
                pl.BlockSpec((tm, tk), lambda i, j: (i, 0)),   # x
                pl.BlockSpec((tn, tk), lambda i, j: (j, 0)),   # weight_mu
                pl.BlockSpec((tn, tk), lambda i, j: (j, 0)),   # weight_sigma
                pl.BlockSpec((1, tk),  lambda i, j: (0, 0)),   # eps_in (row)
                pl.BlockSpec((tn, 1),  lambda i, j: (j, 0)),   # eps_out (col)
                pl.BlockSpec((1, tn),  lambda i, j: (0, j)),   # bias_mu
                pl.BlockSpec((1, tn),  lambda i, j: (0, j)),   # bias_sigma
                pl.BlockSpec((1, tn),  lambda i, j: (0, j)),   # eps_out (row)
            ],
            out_specs=pl.BlockSpec((tm, tn), lambda i, j: (i, j)),
            scratch_shapes=[],
        )
        kernel = _noisy_linear_kernel_single
        dim_sems = ("parallel", "parallel")
    else:
        grid_spec = pltpu.PrefetchScalarGridSpec(
            num_scalar_prefetch=0,
            grid=(n_i, n_j, n_k),
            in_specs=[
                pl.BlockSpec((tm, tk), lambda i, j, k: (i, k)),   # x
                pl.BlockSpec((tn, tk), lambda i, j, k: (j, k)),   # weight_mu
                pl.BlockSpec((tn, tk), lambda i, j, k: (j, k)),   # weight_sigma
                pl.BlockSpec((1, tk),  lambda i, j, k: (0, k)),   # eps_in (row)
                pl.BlockSpec((tn, 1),  lambda i, j, k: (j, 0)),   # eps_out (col)
                pl.BlockSpec((1, tn),  lambda i, j, k: (0, j)),   # bias_mu
                pl.BlockSpec((1, tn),  lambda i, j, k: (0, j)),   # bias_sigma
                pl.BlockSpec((1, tn),  lambda i, j, k: (0, j)),   # eps_out (row)
            ],
            out_specs=pl.BlockSpec((tm, tn), lambda i, j, k: (i, j)),
            scratch_shapes=[pltpu.VMEM((tm, tn), jnp.float32)],
        )
        kernel = _noisy_linear_kernel_acc
        dim_sems = ("parallel", "parallel", "arbitrary")

    out = pl.pallas_call(
        kernel,
        out_shape=jax.ShapeDtypeStruct((bp, np_), f32),
        grid_spec=grid_spec,
        compiler_params=pltpu.CompilerParams(
            dimension_semantics=dim_sems,
            vmem_limit_bytes=_VMEM_LIMIT_BYTES),
        cost_estimate=cost,
    )(xp, wmup, wsigp, einp, eoutc, bmup, bsigp, eoutr)

    if bp == batch and np_ == out_dim:
        return out
    return out[:batch, :out_dim]


# --------------------------------------------------------------------------- #
# Parameter / noise init matching the PyTorch module, pure-JAX reference, tests
# --------------------------------------------------------------------------- #
def scale_noise(key, size):
    # Matches NoisyLinear.scale_noise: sign(x) * sqrt(|x|), x ~ N(0, 1).
    x = jax.random.normal(key, (size,), dtype=jnp.float32)
    return jnp.sign(x) * jnp.sqrt(jnp.abs(x))


def init_noisy_linear(key, input_dim, output_dim, std_init=0.5):
    """reset_parameters() + reset_noise(). Returns the factored noise; the
    module's buffers are weight_epsilon = outer(eps_out, eps_in),
    bias_epsilon = eps_out."""
    k_wmu, k_bmu, k_ein, k_eout = jax.random.split(key, 4)
    mu_range = 1.0 / math.sqrt(input_dim)

    weight_mu = jax.random.uniform(
        k_wmu, (output_dim, input_dim), jnp.float32, -mu_range, mu_range)
    weight_sigma = jnp.full((output_dim, input_dim),
                            std_init / math.sqrt(input_dim), jnp.float32)
    bias_mu = jax.random.uniform(
        k_bmu, (output_dim,), jnp.float32, -mu_range, mu_range)
    bias_sigma = jnp.full((output_dim,),
                          std_init / math.sqrt(output_dim), jnp.float32)

    eps_in = scale_noise(k_ein, input_dim)      # (in_dim,)
    eps_out = scale_noise(k_eout, output_dim)   # (out_dim,)

    return (weight_mu, weight_sigma, eps_in, eps_out, bias_mu, bias_sigma)


def _reference(x, weight_mu, weight_sigma, eps_in, eps_out, bias_mu, bias_sigma):
    # Pure-JAX reference of the PyTorch forward (full epsilon matrices built).
    weight_epsilon = jnp.outer(eps_out, eps_in)
    bias_epsilon = eps_out
    w_eff = weight_mu + weight_sigma * weight_epsilon
    b_eff = bias_mu + bias_sigma * bias_epsilon
    return jnp.dot(x, w_eff.T, precision=jax.lax.Precision.HIGHEST) + b_eff


def _check(key, batch, input_dim, output_dim, tiles=None):
    k_param, k_x = jax.random.split(key)
    params = init_noisy_linear(k_param, input_dim, output_dim, std_init=0.5)
    x = jax.random.normal(k_x, (batch, input_dim), dtype=jnp.float32)

    out = jax.block_until_ready(noisy_linear(x, *params, tiles=tiles))
    ref = _reference(x, *params)

    assert out.shape == (batch, output_dim)
    assert jnp.allclose(out, ref, atol=1e-3, rtol=1e-3), (
        f"mismatch vs reference (B={batch}, in={input_dim}, out={output_dim}): "
        f"max abs diff {jnp.max(jnp.abs(out - ref))}")


if __name__ == "__main__":
    key = jax.random.PRNGKey(0)
    k0, k1, k2, k3 = jax.random.split(key, 4)

    # Small demo shapes consistent with the module (single tile everywhere).
    _check(k0, batch=8, input_dim=32, output_dim=64)

    # Non-128-multiple out_dim: multiple parallel j tiles, full-K fast path.
    _check(k1, batch=64, input_dim=640, output_dim=320)

    # Forced multi-K reduction (accumulator kernel) at small shapes.
    _check(k2, batch=16, input_dim=256, output_dim=128, tiles=(16, 128, 128))

    # Auto-selected multi-K path (kp=4096 -> tk=2048, 2 reduction steps).
    _check(k3, batch=32, input_dim=4096, output_dim=256)

    print("KERNEL_OK")
</pallas_src>

<mosaic_0001>
module attributes {stable_mosaic.version = 11 : i64} {
  func.func @_noisy_linear_kernel_single(%arg0: i32, %arg1: i32, %arg2: memref<8x128xf32, #tpu.memory_space<vmem>>, %arg3: memref<128x128xf32, #tpu.memory_space<vmem>>, %arg4: memref<128x128xf32, #tpu.memory_space<vmem>>, %arg5: memref<1x128xf32, #tpu.memory_space<vmem>>, %arg6: memref<128x1xf32, #tpu.memory_space<vmem>>, %arg7: memref<1x128xf32, #tpu.memory_space<vmem>>, %arg8: memref<1x128xf32, #tpu.memory_space<vmem>>, %arg9: memref<1x128xf32, #tpu.memory_space<vmem>>, %arg10: memref<8x128xf32, #tpu.memory_space<vmem>>) attributes {dimension_semantics = [#tpu.dimension_semantics<parallel>, #tpu.dimension_semantics<parallel>], iteration_bounds = array<i64: 1, 1>, scalar_prefetch = 0 : i64, scratch_operands = 0 : i64, tpu.core_type = #tpu.core_type<tc>, window_params = [{transform_indices = @transform_0, window_bounds = array<i64: 8, 128>}, {transform_indices = @transform_1, window_bounds = array<i64: 128, 128>}, {transform_indices = @transform_2, window_bounds = array<i64: 128, 128>}, {pipeline_mode = #tpu.pipeline_mode<synchronous>, transform_indices = @transform_3, window_bounds = array<i64: 1, 128>}, {transform_indices = @transform_4, window_bounds = array<i64: 128, 1>}, {transform_indices = @transform_5, window_bounds = array<i64: 1, 128>}, {transform_indices = @transform_6, window_bounds = array<i64: 1, 128>}, {transform_indices = @transform_7, window_bounds = array<i64: 1, 128>}, {transform_indices = @transform_8, window_bounds = array<i64: 8, 128>}]} {
    %c0 = arith.constant 0 : index
    %c0_0 = arith.constant 0 : index
    %0 = vector.load %arg3[%c0, %c0_0] : memref<128x128xf32, #tpu.memory_space<vmem>>, vector<128x128xf32>
    %c0_1 = arith.constant 0 : index
    %c0_2 = arith.constant 0 : index
    %1 = vector.load %arg4[%c0_1, %c0_2] : memref<128x128xf32, #tpu.memory_space<vmem>>, vector<128x128xf32>
    %c0_3 = arith.constant 0 : index
    %c0_4 = arith.constant 0 : index
    %2 = vector.load %arg6[%c0_3, %c0_4] : memref<128x1xf32, #tpu.memory_space<vmem>>, vector<128x1xf32>
    %c0_5 = arith.constant 0 : index
    %c0_6 = arith.constant 0 : index
    %3 = vector.load %arg5[%c0_5, %c0_6] : memref<1x128xf32, #tpu.memory_space<vmem>>, vector<1x128xf32>
    %4 = vector.broadcast %2 : vector<128x1xf32> to vector<128x128xf32>
    %5 = vector.broadcast %3 : vector<1x128xf32> to vector<128x128xf32>
    %6 = arith.mulf %4, %5 : vector<128x128xf32>
    %7 = arith.mulf %1, %6 : vector<128x128xf32>
    %8 = arith.addf %0, %7 : vector<128x128xf32>
    %c0_7 = arith.constant 0 : index
    %c0_8 = arith.constant 0 : index
    %9 = vector.load %arg7[%c0_7, %c0_8] : memref<1x128xf32, #tpu.memory_space<vmem>>, vector<1x128xf32>
    %c0_9 = arith.constant 0 : index
    %c0_10 = arith.constant 0 : index
    %10 = vector.load %arg8[%c0_9, %c0_10] : memref<1x128xf32, #tpu.memory_space<vmem>>, vector<1x128xf32>
    %c0_11 = arith.constant 0 : index
    %c0_12 = arith.constant 0 : index
    %11 = vector.load %arg9[%c0_11, %c0_12] : memref<1x128xf32, #tpu.memory_space<vmem>>, vector<1x128xf32>
    %12 = arith.mulf %10, %11 : vector<1x128xf32>
    %13 = arith.addf %9, %12 : vector<1x128xf32>
    %c0_13 = arith.constant 0 : index
    %c0_14 = arith.constant 0 : index
    %14 = vector.load %arg2[%c0_13, %c0_14] : memref<8x128xf32, #tpu.memory_space<vmem>>, vector<8x128xf32>
    %cst = arith.constant dense<0.000000e+00> : vector<8x128xf32>
    %15 = tpu.matmul %14, %8, %cst {dimension_numbers = #tpu.dot_dimension_numbers<[1], [1], [0], [0], [0, 0, 1, 0], [], []>} : vector<8x128xf32>, vector<128x128xf32>, vector<8x128xf32> -> vector<8x128xf32>
    %16 = vector.broadcast %13 : vector<1x128xf32> to vector<8x128xf32>
    %17 = arith.addf %15, %16 : vector<8x128xf32>
    %c0_15 = arith.constant 0 : index
    %c0_16 = arith.constant 0 : index
    %18 = vector.load %arg10[%c0_15, %c0_16] : memref<8x128xf32, #tpu.memory_space<vmem>>, vector<8x128xf32>
    tpu.vector_store %arg10[%c0_15, %c0_16], %17 {strides = array<i32>} : memref<8x128xf32, #tpu.memory_space<vmem>>, vector<8x128xf32>,
    return
  }
  func.func @transform_0(%arg0: i32, %arg1: i32) -> (i32, i32) {
    %c0_i32 = arith.constant 0 : i32
    %c0_i32_0 = arith.constant 0 : i32
    return %arg0, %c0_i32 : i32, i32
  }
  func.func @transform_1(%arg0: i32, %arg1: i32) -> (i32, i32) {
    %c0_i32 = arith.constant 0 : i32
    %c0_i32_0 = arith.constant 0 : i32
    return %arg1, %c0_i32 : i32, i32
  }
  func.func @transform_2(%arg0: i32, %arg1: i32) -> (i32, i32) {
    %c0_i32 = arith.constant 0 : i32
    %c0_i32_0 = arith.constant 0 : i32
    return %arg1, %c0_i32 : i32, i32
  }
  func.func @transform_3(%arg0: i32, %arg1: i32) -> (i32, i32) {
    %c0_i32 = arith.constant 0 : i32
    %c0_i32_0 = arith.constant 0 : i32
    %c0_i32_1 = arith.constant 0 : i32
    return %c0_i32, %c0_i32_0 : i32, i32
  }
  func.func @transform_4(%arg0: i32, %arg1: i32) -> (i32, i32) {
    %c0_i32 = arith.constant 0 : i32
    %c0_i32_0 = arith.constant 0 : i32
    return %arg1, %c0_i32 : i32, i32
  }
  func.func @transform_5(%arg0: i32, %arg1: i32) -> (i32, i32) {
    %c0_i32 = arith.constant 0 : i32
    %c0_i32_0 = arith.constant 0 : i32
    return %c0_i32, %arg1 : i32, i32
  }
  func.func @transform_6(%arg0: i32, %arg1: i32) -> (i32, i32) {
    %c0_i32 = arith.constant 0 : i32
    %c0_i32_0 = arith.constant 0 : i32
    return %c0_i32, %arg1 : i32, i32
  }
  func.func @transform_7(%arg0: i32, %arg1: i32) -> (i32, i32) {
    %c0_i32 = arith.constant 0 : i32
    %c0_i32_0 = arith.constant 0 : i32
    return %c0_i32, %arg1 : i32, i32
  }
  func.func @transform_8(%arg0: i32, %arg1: i32) -> (i32, i32) {
    %c0_i32 = arith.constant 0 : i32
    return %arg0, %arg1 : i32, i32
  }
}

</mosaic_0001>

<bundles_post_ra>
// kernel: tpu_custom_call.1
= control target key start
LH: loop header
LB: loop body
LE: loop exit
PB: predicated region body
PF: predicated region fallthrough
CT: control target
= control target key end

     0   :  { %13 = vsyncpa [#allocation3], 0  ;;  %s672_s0 = inlined_call_operand.hbm [shape: f32[8,128], index: 0, kind: input, shape index: {}]   ;;  %s673_s1 = inlined_call_operand.vmem [shape: f32[128,128], index: 1, kind: input, shape index: {}]   ;;  %s674_s2 = inlined_call_operand.hbm [shape: f32[128,128], index: 2, kind: input, shape index: {}]   ;;  %s675_s3 = inlined_call_operand.vmem [shape: f32[1,128], index: 3, kind: input, shape index: {}]   ;;  %s676_s4 = inlined_call_operand.vmem [shape: f32[128,1], index: 4, kind: input, shape index: {}]   ;;  %s677_s5 = inlined_call_operand.vmem [shape: f32[1,128], index: 5, kind: input, shape index: {}]   ;;  %s678_s6 = inlined_call_operand.vmem [shape: f32[1,128], index: 6, kind: input, shape index: {}]   ;;  %s679_s7 = inlined_call_operand.vmem [shape: f32[1,128], index: 7, kind: input, shape index: {}]   ;;  %s680_s8 = inlined_call_operand.hbm [shape: f32[8,128], index: 8, kind: output, shape index: {}]  }
   0x1   :  { %14 = vsyncpa [#allocation6], 0 }
   0x2   :  { %15 = vsyncpa [#allocation4], 0  ;;  %s467_s27 = smov [#allocation2]   ;;  %s468_s29 = smov [#allocation5]  }
   0x3   :  { %s22_s28 = sshll.u32 %s467_s27, 4  ;;  %s33_s30 = sshll.u32 %s468_s29, 4  ;;  %s23_s28 = int_to_ptr.vmem [resolvable:$true] %s22_s28  ;;  %s34_s30 = int_to_ptr.vmem [resolvable:$true] %s33_s30 }
   0x4   :  { %s409_s9 = scalar_lea.vmem %s23_s28, 128  ;;  %p414_p1 = scmp.lt.s32.totalorder %s23_s28, %s23_s28 }
   0x5   :  { %p410_p0 = scmp.ne.s32.totalorder %s23_s28, %s409_s9  ;;  %p415_p2 = scmp.lt.s32.totalorder %s409_s9, %s409_s9 }
   0x7   :  { %p416_p3 = por %p415_p2, %p414_p1 }
   0x9   :  { %p417_p4 = pnand %p416_p3, %p410_p0 }
   0xb   :  { %420 = shalt.err (!%p417_p4)
}
   0xc   :  { %25 = dma.hbm_to_vmem [thread:$0]  %s672_s0, 128, %s23_s28, [#allocation3]  }
   0xd   :  { %s429_s12 = scalar_lea.vmem %s34_s30, 2048  ;;  %p434_p6 = scmp.lt.s32.totalorder %s34_s30, %s34_s30 }
   0xe   :  { %p430_p5 = scmp.ne.s32.totalorder %s34_s30, %s429_s12  ;;  %p435_p7 = scmp.lt.s32.totalorder %s429_s12, %s429_s12 }
  0x10   :  { %p436_p8 = por %p435_p7, %p434_p6 }
  0x12   :  { %p437_p9 = pnand %p436_p8, %p430_p5 }
  0x14   :  { %440 = shalt.err (!%p437_p9)
}
  0x15   :  { %s469_s13 = smov 128   ;;  %s470_s14 = smov 8  }
  0x16   :  { %39 = dma.hbm_to_vmem [thread:$0]  %s674_s2, 2048, %s34_s30, [#allocation6], %s469_s13, %s469_s13, %s470_s14  }
  0x17   :  { %461 = dma.done.wait [#allocation3], 128  }
  0x18   :  { %462 = vsyncadd [#allocation3], 4294967168 }
  0x19   :  { %463 = dma.done.wait [#allocation6], 2048  }
  0x1a   :  { %464 = vsyncadd [#allocation6], 4294965248  ;;  %v471_v0 = vmov 0   ;;  %v103_v1 = vld [vmem:[%s676_s4 + $0x78] sm:$0xff]  ;;  %v101_v2 = vld [vmem:[%s676_s4 + $0x68] sm:$0xff]  ;;  %v472_v5 = vmov 0.0  }
  0x1b   :  { %400 = vset.pattern.permute.xlu1 %v471_v0  ;;  %399 = vset.pattern.permute.xlu0 %v471_v0  ;;  %v102_v3 = vld [vmem:[%s676_s4 + $0x70] sm:$0xff]  ;;  %v100_v4 = vld [vmem:[%s676_s4 + $0x60] sm:$0xff]  ;;  %v99_v6 = vld [vmem:[%s676_s4 + $0x58] sm:$0xff]  ;;  %vm473_vm0 = vmmov 0   ;;  %s474_s12 = smov [#allocation7]  }
  0x1c   :  { %182 = vperm.xlu0 %399, %v103_v1   ;;  %172 = vperm.xlu1 %400, %v101_v2   ;;  %v98_v7 = vld [vmem:[%s676_s4 + $0x50] sm:$0xff]  ;;  %v97_v8 = vld [vmem:[%s676_s4 + $0x48] sm:$0xff]  ;;  %v96_v9 = vld [vmem:[%s676_s4 + $0x40] sm:$0xff]  ;;  %s328_s13 = sshll.u32 %s474_s12, 4  ;;  %s329_s13 = int_to_ptr.vmem [resolvable:$true] %s328_s13 }
  0x1d   :  { %356 = vmatprep.subr.mxu0 %v472_v5  ;;  %v95_v10 = vld [vmem:[%s676_s4 + $0x38] sm:$0xff]  ;;  %v94_v11 = vld [vmem:[%s676_s4 + $0x30] sm:$0xff]  ;;  %v93_v12 = vld [vmem:[%s676_s4 + $0x28] sm:$0xff]  ;;  %388 = vmatprep.mubr.msk.f32.mxu0 %vm473_vm0, %v472_v5  ;;  %p446_p11 = scmp.lt.s32.totalorder %s329_s13, %s329_s13 }
  0x1e   :  { %v92_v13 = vld [vmem:[%s676_s4 + $0x20] sm:$0xff]  ;;  %v91_v14 = vld [vmem:[%s676_s4 + $0x18] sm:$0xff]  ;;  %v90_v15 = vld [vmem:[%s676_s4 + $0x10] sm:$0xff] }
  0x1f   :  { %v89_v16 = vld [vmem:[%s676_s4 + $0x8] sm:$0xff]  ;;  %v88_v17 = vld [vmem:[%s676_s4] sm:$0xff]  ;;  %v71_v23 = vld [vmem:[%s673_s1 + $0x78] sm:$0xff] }
  0x20   :  { %177 = vperm.xlu0 %399, %v102_v3   ;;  %167 = vperm.xlu1 %400, %v100_v4   ;;  %v579_v18 = vld [vmem:[%s675_s3] ss:$0 sm:$0xff]  ;;  %v85_v26 = vld [vmem:[#allocation5 + $0x68] sm:$0xff]  ;;  %v86_v28 = vld [vmem:[#allocation5 + $0x70] sm:$0xff] }
  0x21   :  { %v87_v20 = vld [vmem:[#allocation5 + $0x78] sm:$0xff]  ;;  %v70_v31 = vld [vmem:[%s673_s1 + $0x70] sm:$0xff]  ;;  %v69_v35 = vld [vmem:[%s673_s1 + $0x68] sm:$0xff] }
  0x22   :  { %v84_v38 = vld [vmem:[#allocation5 + $0x60] sm:$0xff]  ;;  %v83_v43 = vld [vmem:[#allocation5 + $0x58] sm:$0xff]  ;;  %v82_v49 = vld [vmem:[#allocation5 + $0x50] sm:$0xff] }
  0x23   :  { %v68_v45 = vld [vmem:[%s673_s1 + $0x60] sm:$0xff]  ;;  %v67_v51 = vld [vmem:[%s673_s1 + $0x58] sm:$0xff]  ;;  %v81_v55 = vld [vmem:[#allocation5 + $0x48] sm:$0xff] }
  0x24   :  { %162 = vperm.xlu0 %399, %v99_v6   ;;  %157 = vperm.xlu1 %400, %v98_v7   ;;  %v66_v57 = vld [vmem:[%s673_s1 + $0x50] sm:$0xff]  ;;  %v80_v61 = vld [vmem:[#allocation5 + $0x40] sm:$0xff]  ;;  %v79_v3 = vld [vmem:[#allocation5 + $0x38] sm:$0xff] }
  0x25   :  { %v65_v63 = vld [vmem:[%s673_s1 + $0x48] sm:$0xff]  ;;  %v64_v6 = vld [vmem:[%s673_s1 + $0x40] sm:$0xff] }
  0x28   :  { %152 = vperm.xlu0 %399, %v97_v8   ;;  %147 = vperm.xlu1 %400, %v96_v9  }
  0x2c   :  { %142 = vperm.xlu0 %399, %v95_v10   ;;  %137 = vperm.xlu1 %400, %v94_v11   ;;  %v78_v10 = vld [vmem:[#allocation5 + $0x30] sm:$0xff] }
  0x30   :  { %132 = vperm.xlu0 %399, %v93_v12   ;;  %127 = vperm.xlu1 %400, %v92_v13   ;;  %v63_v12 = vld [vmem:[%s673_s1 + $0x38] sm:$0xff] }
  0x34   :  { %122 = vperm.xlu0 %399, %v91_v14   ;;  %117 = vperm.xlu1 %400, %v90_v15  }
  0x38   :  { %112 = vperm.xlu0 %399, %v89_v16   ;;  %107 = vperm.xlu1 %400, %v88_v17   ;;  %v77_v16 = vld [vmem:[#allocation5 + $0x28] sm:$0xff] }
  0x97   :  { %v183_v19 = vpop.permute.xlu0 %182  ;;  %v173_v22 = vpop.permute.xlu1 %172 }
  0x98   :  { %v206_v21 = vmul.f32 %v579_v18, %v183_v19  ;;  %v204_v25 = vmul.f32 %v579_v18, %v173_v22  ;;  %v62_v19 = vld [vmem:[%s673_s1 + $0x30] sm:$0xff] }
  0x9a   :  { %v222_v24 = vmul.f32 %v206_v21, %v87_v20  ;;  %v220_v32 = vmul.f32 %v204_v25, %v85_v26  ;;  %v61_v25 = vld [vmem:[%s673_s1 + $0x28] sm:$0xff] }
  0x9b   :  { %v178_v27 = vpop.permute.xlu0 %177  ;;  %v168_v34 = vpop.permute.xlu1 %167 }
  0x9c   :  { %v205_v29 = vmul.f32 %v579_v18, %v178_v27  ;;  %v238_v30 = vadd.f32 %v222_v24, %v71_v23  ;;  %v203_v36 = vmul.f32 %v579_v18, %v168_v34  ;;  %v236_v40 = vadd.f32 %v220_v32, %v69_v35  ;;  %v76_v23 = vld [vmem:[#allocation5 + $0x20] sm:$0xff]  ;;  %v74_v35 = vld [vmem:[#allocation5 + $0x10] sm:$0xff] }
  0x9e   :  { %v221_v33 = vmul.f32 %v205_v29, %v86_v28  ;;  %357 = vmatpush3.xpose.msra.mxu0 %v238_v30  ;;  %v219_v41 = vmul.f32 %v203_v36, %v84_v38  ;;  %v75_v29 = vld [vmem:[#allocation5 + $0x18] sm:$0xff] }
  0x9f   :  { %358 = vmatprep.subr.mxu0 %v472_v5  ;;  %v163_v39 = vpop.permute.xlu0 %162  ;;  %v158_v44 = vpop.permute.xlu1 %157 }
  0xa0   :  { %v237_v37 = vadd.f32 %v221_v33, %v70_v31  ;;  %v202_v42 = vmul.f32 %v579_v18, %v163_v39  ;;  %v201_v47 = vmul.f32 %v579_v18, %v158_v44  ;;  %v235_v48 = vadd.f32 %v219_v41, %v68_v45  ;;  %v60_v31 = vld [vmem:[%s673_s1 + $0x20] sm:$0xff]  ;;  %v73_v41 = vld [vmem:[#allocation5 + $0x8] sm:$0xff] }
  0xa2   :  { %359 = vmatpush3.xpose.msra.mxu0 %v237_v37  ;;  %v218_v46 = vmul.f32 %v202_v42, %v83_v43  ;;  %v217_v52 = vmul.f32 %v201_v47, %v82_v49  ;;  %v59_v37 = vld [vmem:[%s673_s1 + $0x18] sm:$0xff]  ;;  %v58_v43 = vld [vmem:[%s673_s1 + $0x10] sm:$0xff]  ;;  %v72_v47 = vld [vmem:[#allocation5] sm:$0xff] }
  0xa3   :  { %360 = vmatprep.subr.mxu0 %v472_v5  ;;  %v153_v50 = vpop.permute.xlu0 %152  ;;  %v148_v56 = vpop.permute.xlu1 %147 }
  0xa4   :  { %v200_v53 = vmul.f32 %v579_v18, %v153_v50  ;;  %v234_v54 = vadd.f32 %v218_v46, %v67_v51  ;;  %v199_v59 = vmul.f32 %v579_v18, %v148_v56  ;;  %v233_v60 = vadd.f32 %v217_v52, %v66_v57  ;;  %v56_v51 = vld [vmem:[%s673_s1] sm:$0xff] }
  0xa6   :  { %361 = vmatpush3.xpose.msra.mxu0 %v236_v40  ;;  %v216_v58 = vmul.f32 %v200_v53, %v81_v55  ;;  %v215_v0 = vmul.f32 %v199_v59, %v80_v61  ;;  %v246_v53 = vlaneseq  ;;  %v241_v55 = vld [vmem:[%s679_s7] sm:$0x1] }
  0xa7   :  { %362 = vmatprep.subr.mxu0 %v472_v5  ;;  %v143_v62 = vpop.permute.xlu0 %142  ;;  %v138_v4 = vpop.permute.xlu1 %137 }
  0xa8   :  { %v198_v1 = vmul.f32 %v579_v18, %v143_v62  ;;  %v232_v2 = vadd.f32 %v216_v58, %v65_v63  ;;  %v197_v8 = vmul.f32 %v579_v18, %v138_v4  ;;  %v231_v9 = vadd.f32 %v215_v0, %v64_v6  ;;  %v239_v58 = vld [vmem:[%s677_s5] sm:$0x1] }
  0xa9   :  { %v247_v57 = vshrl.u32 %v246_v53, 7 }
  0xaa   :  { %363 = vmatpush3.xpose.msra.mxu0 %v235_v48  ;;  %v214_v7 = vmul.f32 %v198_v1, %v79_v3  ;;  %v213_v13 = vmul.f32 %v197_v8, %v78_v10  ;;  %v57_v48 = vld [vmem:[%s673_s1 + $0x8] sm:$0xff] }
  0xab   :  { %364 = vmatprep.subr.mxu0 %v472_v5  ;;  %v133_v11 = vpop.permute.xlu0 %132  ;;  %v128_v17 = vpop.permute.xlu1 %127  ;;  %v248_v59 = vsub.s32 0, %v247_v57 }
  0xac   :  { %v196_v14 = vmul.f32 %v579_v18, %v133_v11  ;;  %v230_v15 = vadd.f32 %v214_v7, %v63_v12  ;;  %v195_v21 = vmul.f32 %v579_v18, %v128_v17  ;;  %v229_v22 = vadd.f32 %v213_v13, %v62_v19 }
  0xae   :  { %365 = vmatpush3.xpose.msra.mxu0 %v234_v54  ;;  %v212_v20 = vmul.f32 %v196_v14, %v77_v16  ;;  %v211_v26 = vmul.f32 %v195_v21, %v76_v23  ;;  %v240_v54 = vld [vmem:[%s678_s6] sm:$0x1]  ;;  %s441_s6 = scalar_lea.vmem %s329_s13, 128 }
  0xaf   :  { %366 = vmatprep.subr.mxu0 %v472_v5  ;;  %v123_v24 = vpop.permute.xlu0 %122  ;;  %v118_v30 = vpop.permute.xlu1 %117  ;;  %v242_v56 = vmul.f32 %v241_v55, %v240_v54  ;;  %p442_p10 = scmp.ne.s32.totalorder %s329_s13, %s441_s6  ;;  %p447_p12 = scmp.lt.s32.totalorder %s441_s6, %s441_s6 }
  0xb0   :  { %v194_v27 = vmul.f32 %v579_v18, %v123_v24  ;;  %v228_v28 = vadd.f32 %v212_v20, %v61_v25  ;;  %v193_v33 = vmul.f32 %v579_v18, %v118_v30  ;;  %v227_v34 = vadd.f32 %v211_v26, %v60_v31 }
  0xb1   :  { %p448_p13 = por %p447_p12, %p446_p11 }
  0xb2   :  { %367 = vmatpush3.xpose.msra.mxu0 %v233_v60  ;;  %v210_v32 = vmul.f32 %v194_v27, %v75_v29  ;;  %v209_v38 = vmul.f32 %v193_v33, %v74_v35 }
  0xb3   :  { %368 = vmatprep.subr.mxu0 %v472_v5  ;;  %v113_v36 = vpop.permute.xlu0 %112  ;;  %v108_v42 = vpop.permute.xlu1 %107  ;;  %p449_p0 = pnand %p448_p13, %p442_p10 }
  0xb4   :  { %v192_v39 = vmul.f32 %v579_v18, %v113_v36  ;;  %v226_v40 = vadd.f32 %v210_v32, %v59_v37  ;;  %v191_v45 = vmul.f32 %v579_v18, %v108_v42  ;;  %v225_v46 = vadd.f32 %v209_v38, %v58_v43  ;;  %v244_v18 = vld [vmem:[#allocation2] sm:$0xff] }
  0xb6   :  { %369 = vmatpush3.xpose.msra.mxu0 %v232_v2  ;;  %v208_v44 = vmul.f32 %v192_v39, %v73_v41  ;;  %v207_v49 = vmul.f32 %v191_v45, %v72_v47 }
  0xb7   :  { %370 = vmatprep.subr.mxu0 %v472_v5 }
  0xb8   :  { %v224_v50 = vadd.f32 %v208_v44, %v57_v48  ;;  %v223_v52 = vadd.f32 %v207_v49, %v56_v51 }
  0xba   :  { %371 = vmatpush3.xpose.msra.mxu0 %v231_v9 }
  0xbb   :  { %372 = vmatprep.subr.mxu0 %v472_v5 }
  0xbe   :  { %373 = vmatpush3.xpose.msra.mxu0 %v230_v15 }
  0xbf   :  { %374 = vmatprep.subr.mxu0 %v472_v5 }
  0xc2   :  { %375 = vmatpush3.xpose.msra.mxu0 %v229_v22 }
  0xc3   :  { %376 = vmatprep.subr.mxu0 %v472_v5 }
  0xc6   :  { %377 = vmatpush3.xpose.msra.mxu0 %v228_v28 }
  0xc7   :  { %378 = vmatprep.subr.mxu0 %v472_v5 }
  0xca   :  { %379 = vmatpush3.xpose.msra.mxu0 %v227_v34 }
  0xcb   :  { %380 = vmatprep.subr.mxu0 %v472_v5 }
  0xce   :  { %381 = vmatpush3.xpose.msra.mxu0 %v226_v40 }
  0xcf   :  { %382 = vmatprep.subr.mxu0 %v472_v5 }
  0xd2   :  { %383 = vmatpush3.xpose.msra.mxu0 %v225_v46 }
  0xd3   :  { %384 = vmatprep.subr.mxu0 %v472_v5 }
  0xd6   :  { %385 = vmatpush3.xpose.msra.mxu0 %v224_v50 }
  0xd7   :  { %386 = vmatprep.subr.mxu0 %v472_v5  ;;  %v243_v5 = vadd.f32 %v242_v56, %v239_v58 }
  0xd9   :  { %v249_v60 = vrot.slane %v243_v5, %v248_v59 }
  0xda   :  { %387 = vmatpush3.xpose.msra.mxu0 %v223_v52 }
  0xdd   :  { %389 = vmatmul.mubr.f32.vlgmr.msra.gmra.mxu0 %v244_v18 }
 0x19d   :  { %v317_v61 = vpop.f32.mrf.mxu0 }
 0x19e   :  { %v318_v62 = vadd.f32 %v317_v61, %v249_v60 }
 0x19f   :  { %v390_v63 = vpop.f32.mrf.mxu0 }
 0x1a0   :  { %321 = vst [vmem:[#allocation7] sm:$0xff] %v318_v62 }
 0x1a1   :  { %452 = shalt.err (!%p449_p0)
}
 0x1a2   :  { %331 = dma.vmem_to_hbm [thread:$0]  %s329_s13, 128, %s680_s8, [#allocation4]  }
 0x1a3   :  { %465 = dma.done.wait [#allocation4], 128  }
 0x1a4   :  { %466 = vsyncadd [#allocation4], 4294967168 }
 0x1a5   :  { %335 = vsyncpa [#allocation3], 1 }
 0x1a6   :  { %336 = vsyncpa [#allocation6], 1 }
 0x1a7   :  { %337 = vsyncpa [#allocation4], 1 }

</bundles_post_ra>
